<compile_context>
chip_gen: v6e
topology: v6e:2x2x1
jax: 0.10.0
libtpu: 0.0.40
codegen_flags: <defaults>
</compile_context>

<pallas_src>
import functools

import jax
import jax.numpy as jnp
from jax import lax
from jax.experimental import pallas as pl
from jax.experimental.pallas import tpu as pltpu


def _attention_kernel(trg_ref, src_ref, ctx_ref, w_ref, *, mxu_dtype):
    """One (B_TILE, T_TILE) block: scores -> softmax -> context, all in VMEM."""
    trg = trg_ref[...]                      # (Bt, Tt, D)
    src = src_ref[...]                      # (Bt, S,  D)

    # MXU operands in bf16 (f32 accumulation); softmax stays f32.
    trg_mm = trg if mxu_dtype is None else trg.astype(mxu_dtype)
    src_mm = src if mxu_dtype is None else src.astype(mxu_dtype)

    # scores = trg @ src^T expressed as a contraction over the last dims of
    # both operands -> maps straight onto the MXU, no explicit transpose.
    scores = lax.dot_general(
        trg_mm, src_mm,
        dimension_numbers=(((2,), (2,)), ((0,), (0,))),
        preferred_element_type=jnp.float32)              # (Bt, Tt, S) f32

    # Numerically-stable softmax over src_len (last axis).
    m = jnp.max(scores, axis=-1, keepdims=True)
    e = jnp.exp(scores - m)
    denom = jnp.sum(e, axis=-1, keepdims=True)
    weights = e * pl.reciprocal(denom, approx=True)      # EUP vrcp (free-ish)

    w_low = weights if mxu_dtype is None else weights.astype(mxu_dtype)
    context = lax.dot_general(
        w_low, src_mm,
        dimension_numbers=(((2,), (1,)), ((0,), (0,))),
        preferred_element_type=jnp.float32)              # (Bt, Tt, D) f32

    # TODO(synk): for large non-128-multiple S, emit weights into a lane-dense
    # padded (T, S_pad) slab and slice in the wrapper to avoid masked stores.
    w_ref[...] = weights.astype(w_ref.dtype)
    ctx_ref[...] = context.astype(ctx_ref.dtype)


def _choose_t_tile(T, S, D, itemsize=4):
    """Largest multiple-of-8 T tile whose working set fits a v7x-safe budget."""
    if T <= 8:
        return T
    budget = 6 << 20                        # per-block working-set target (bytes)
    fixed = itemsize * S * D                # resident src block
    per_row = itemsize * (S + 2 * D)        # trg + ctx + weights rows
    t = (budget - fixed) // max(per_row, 1)
    t = max(8, min(int(t), 512, T))
    t = (t // 8) * 8
    return T if t >= T else max(8, t)


def _choose_b_tile(B, T, S, D, t_tile, itemsize=4):
    """Pack batch elements per grid step when T is tiny (amortize step cost),
    but keep >= 2 grid steps so both TensorCores (v7x) get work."""
    per_batch = itemsize * (t_tile * (S + 2 * D) + S * D)
    target = 1 << 20
    bt = max(1, min(B, target // max(per_batch, 1)))
    while bt > 1 and pl.cdiv(B, bt) * pl.cdiv(T, t_tile) < 2:
        bt -= 1
    return int(bt)


def attention_dot(trg_outs, src_outs, mxu_dtype=jnp.bfloat16):
    """Pallas implementation of Attention(score_type='dot').forward.

    trg_outs: (B, T, D) or (B, D)  (2-D input is unsqueezed to T=1, as in torch)
    src_outs: (B, S, D)
    mxu_dtype: dtype for MXU operands (None -> keep input precision).
    returns (context (B, T, D), weights (B, T, S))
    """
    if trg_outs.ndim != 3:
        trg_outs = trg_outs[:, None, :]
    B, T, D = trg_outs.shape
    _, S, _ = src_outs.shape

    itemsize = jnp.dtype(trg_outs.dtype).itemsize
    t_tile = _choose_t_tile(T, S, D, itemsize)
    b_tile = _choose_b_tile(B, T, S, D, t_tile, itemsize)
    grid = (pl.cdiv(B, b_tile), pl.cdiv(T, t_tile))

    cp_kwargs = dict(dimension_semantics=("parallel", "parallel"))
    block_bytes = itemsize * b_tile * (2 * t_tile * D + S * D + t_tile * S)
    vmem_est = 3 * block_bytes              # double-buffered blocks + temporaries
    if vmem_est > (32 << 20):
        cp_kwargs["vmem_limit_bytes"] = int(min(vmem_est, 48 << 20))

    out_shapes = (
        jax.ShapeDtypeStruct((B, T, D), trg_outs.dtype),
        jax.ShapeDtypeStruct((B, T, S), trg_outs.dtype),
    )

    kernel = functools.partial(_attention_kernel, mxu_dtype=mxu_dtype)

    context, weights = pl.pallas_call(
        kernel,
        out_shape=out_shapes,
        grid=grid,
        in_specs=[
            pl.BlockSpec((b_tile, t_tile, D), lambda b, t: (b, t, 0)),
            pl.BlockSpec((b_tile, S, D), lambda b, t: (b, 0, 0)),
        ],
        out_specs=[
            pl.BlockSpec((b_tile, t_tile, D), lambda b, t: (b, t, 0)),
            pl.BlockSpec((b_tile, t_tile, S), lambda b, t: (b, t, 0)),
        ],
        compiler_params=pltpu.CompilerParams(**cp_kwargs),
    )(trg_outs, src_outs)
    return context, weights


def _reference(trg_outs, src_outs, mxu_dtype=None):
    """Pure-JAX reference, optionally emulating the bf16-operand MXU path."""
    t = trg_outs if mxu_dtype is None else trg_outs.astype(mxu_dtype)
    s = src_outs if mxu_dtype is None else src_outs.astype(mxu_dtype)
    scores = jnp.einsum("btd,bsd->bts", t, s,
                        preferred_element_type=jnp.float32)
    weights = jax.nn.softmax(scores, axis=2)
    w = weights if mxu_dtype is None else weights.astype(mxu_dtype)
    context = jnp.einsum("bts,bsd->btd", w, s,
                         preferred_element_type=jnp.float32)
    return context.astype(trg_outs.dtype), weights.astype(trg_outs.dtype)


if __name__ == "__main__":
    key = jax.random.PRNGKey(0)
    k1, k2, k3, k4 = jax.random.split(key, 4)

    # --- 3-D case (batch=2, trg_len=8, src_len=8, hidden=32) ------------------
    B, T, S, D = 2, 8, 8, 32
    trg = jax.random.normal(k1, (B, T, D), dtype=jnp.float32)
    src = jax.random.normal(k2, (B, S, D), dtype=jnp.float32)

    # Default (bf16 MXU operands, f32 accumulation) vs bf16-emulated reference.
    ctx, w = attention_dot(trg, src)
    jax.block_until_ready((ctx, w))
    ctx_r, w_r = _reference(trg, src, mxu_dtype=jnp.bfloat16)
    assert jnp.allclose(ctx, ctx_r, atol=2e-2, rtol=2e-2)
    assert jnp.allclose(w, w_r, atol=2e-2, rtol=2e-2)

    # Full-precision path vs exact f32 reference.
    ctx32, w32 = attention_dot(trg, src, mxu_dtype=None)
    jax.block_until_ready((ctx32, w32))
    ctx_r32, w_r32 = _reference(trg, src)
    assert jnp.allclose(ctx32, ctx_r32, atol=5e-3, rtol=5e-3)
    assert jnp.allclose(w32, w_r32, atol=5e-3, rtol=5e-3)

    # --- 2-D decoder case (trg is (B, D); module unsqueezes to T=1) -----------
    S2 = 16
    trg2 = jax.random.normal(k3, (B, D), dtype=jnp.float32)
    src2 = jax.random.normal(k4, (B, S2, D), dtype=jnp.float32)
    ctx2, w2 = attention_dot(trg2, src2)
    jax.block_until_ready((ctx2, w2))
    ctx2_r, w2_r = _reference(trg2[:, None, :], src2, mxu_dtype=jnp.bfloat16)
    assert ctx2.shape == (B, 1, D) and w2.shape == (B, 1, S2)
    assert jnp.allclose(ctx2, ctx2_r, atol=2e-2, rtol=2e-2)
    assert jnp.allclose(w2, w2_r, atol=2e-2, rtol=2e-2)

    print("KERNEL_OK")
</pallas_src>

<mosaic_0001>
module attributes {stable_mosaic.version = 11 : i64} {
  func.func @_attention_kernel(%arg0: i32, %arg1: i32, %arg2: memref<1x8x32xf32, #tpu.memory_space<vmem>>, %arg3: memref<1x8x32xf32, #tpu.memory_space<vmem>>, %arg4: memref<1x8x32xf32, #tpu.memory_space<vmem>>, %arg5: memref<1x8x8xf32, #tpu.memory_space<vmem>>) attributes {dimension_semantics = [#tpu.dimension_semantics<parallel>, #tpu.dimension_semantics<parallel>], iteration_bounds = array<i64: 2, 1>, scalar_prefetch = 0 : i64, scratch_operands = 0 : i64, tpu.core_type = #tpu.core_type<tc>, window_params = [{transform_indices = @transform_0, window_bounds = array<i64: 1, 8, 32>}, {transform_indices = @transform_1, window_bounds = array<i64: 1, 8, 32>}, {transform_indices = @transform_2, window_bounds = array<i64: 1, 8, 32>}, {transform_indices = @transform_3, window_bounds = array<i64: 1, 8, 8>}]} {
    %c0 = arith.constant 0 : index
    %c0_0 = arith.constant 0 : index
    %c0_1 = arith.constant 0 : index
    %0 = vector.load %arg2[%c0, %c0_0, %c0_1] : memref<1x8x32xf32, #tpu.memory_space<vmem>>, vector<1x8x32xf32>
    %c0_2 = arith.constant 0 : index
    %c0_3 = arith.constant 0 : index
    %c0_4 = arith.constant 0 : index
    %1 = vector.load %arg3[%c0_2, %c0_3, %c0_4] : memref<1x8x32xf32, #tpu.memory_space<vmem>>, vector<1x8x32xf32>
    %2 = arith.truncf %0 : vector<1x8x32xf32> to vector<1x8x32xbf16>
    %3 = arith.truncf %1 : vector<1x8x32xf32> to vector<1x8x32xbf16>
    %cst = arith.constant dense<0.000000e+00> : vector<1x8x8xf32>
    %4 = tpu.matmul %2, %3, %cst {dimension_numbers = #tpu.dot_dimension_numbers<[2], [2], [1], [1], [0, 0, 0, 1, 1, 1], [0], [0]>} : vector<1x8x32xbf16>, vector<1x8x32xbf16>, vector<1x8x8xf32> -> vector<1x8x8xf32>
    %cst_5 = arith.constant dense<0xFF800000> : vector<1x8xf32>
    %5 = vector.multi_reduction <maximumf>, %4, %cst_5 [2] : vector<1x8x8xf32> to vector<1x8xf32>
    %6 = vector.shape_cast %5 : vector<1x8xf32> to vector<1x8x1xf32>
    %7 = vector.broadcast %6 : vector<1x8x1xf32> to vector<1x8x8xf32>
    %8 = arith.subf %4, %7 : vector<1x8x8xf32>
    %9 = math.exp %8 : vector<1x8x8xf32>
    %cst_6 = arith.constant dense<0.000000e+00> : vector<1x8xf32>
    %10 = vector.multi_reduction <add>, %9, %cst_6 [2] : vector<1x8x8xf32> to vector<1x8xf32>
    %11 = vector.shape_cast %10 : vector<1x8xf32> to vector<1x8x1xf32>
    %12 = tpu.reciprocal %11 {approx = true} : vector<1x8x1xf32> -> vector<1x8x1xf32>
    %13 = vector.broadcast %12 : vector<1x8x1xf32> to vector<1x8x8xf32>
    %14 = arith.mulf %9, %13 : vector<1x8x8xf32>
    %15 = arith.truncf %14 : vector<1x8x8xf32> to vector<1x8x8xbf16>
    %cst_7 = arith.constant dense<0.000000e+00> : vector<1x8x32xf32>
    %16 = tpu.matmul %15, %3, %cst_7 {dimension_numbers = #tpu.dot_dimension_numbers<[2], [1], [1], [2], [0, 0, 0, 1, 1, 2], [0], [0]>} : vector<1x8x8xbf16>, vector<1x8x32xbf16>, vector<1x8x32xf32> -> vector<1x8x32xf32>
    %c0_8 = arith.constant 0 : index
    %c0_9 = arith.constant 0 : index
    %c0_10 = arith.constant 0 : index
    %17 = vector.load %arg5[%c0_8, %c0_9, %c0_10] : memref<1x8x8xf32, #tpu.memory_space<vmem>>, vector<1x8x8xf32>
    tpu.vector_store %arg5[%c0_8, %c0_9, %c0_10], %14 {strides = array<i32>} : memref<1x8x8xf32, #tpu.memory_space<vmem>>, vector<1x8x8xf32>,
    %c0_11 = arith.constant 0 : index
    %c0_12 = arith.constant 0 : index
    %c0_13 = arith.constant 0 : index
    %18 = vector.load %arg4[%c0_11, %c0_12, %c0_13] : memref<1x8x32xf32, #tpu.memory_space<vmem>>, vector<1x8x32xf32>
    tpu.vector_store %arg4[%c0_11, %c0_12, %c0_13], %16 {strides = array<i32>} : memref<1x8x32xf32, #tpu.memory_space<vmem>>, vector<1x8x32xf32>,
    return
  }
  func.func @transform_0(%arg0: i32, %arg1: i32) -> (i32, i32, i32) {
    %c0_i32 = arith.constant 0 : i32
    %c0_i32_0 = arith.constant 0 : i32
    return %arg0, %arg1, %c0_i32 : i32, i32, i32
  }
  func.func @transform_1(%arg0: i32, %arg1: i32) -> (i32, i32, i32) {
    %c0_i32 = arith.constant 0 : i32
    %c0_i32_0 = arith.constant 0 : i32
    %c0_i32_1 = arith.constant 0 : i32
    return %arg0, %c0_i32, %c0_i32_0 : i32, i32, i32
  }
  func.func @transform_2(%arg0: i32, %arg1: i32) -> (i32, i32, i32) {
    %c0_i32 = arith.constant 0 : i32
    %c0_i32_0 = arith.constant 0 : i32
    return %arg0, %arg1, %c0_i32 : i32, i32, i32
  }
  func.func @transform_3(%arg0: i32, %arg1: i32) -> (i32, i32, i32) {
    %c0_i32 = arith.constant 0 : i32
    %c0_i32_0 = arith.constant 0 : i32
    return %arg0, %arg1, %c0_i32 : i32, i32, i32
  }
}

</mosaic_0001>

<bundles_post_ra>
// kernel: tpu_custom_call.1
= control target key start
LH: loop header
LB: loop body
LE: loop exit
PB: predicated region body
PF: predicated region fallthrough
CT: control target
= control target key end

     0   :  { %9 = vsyncpa [#allocation3], 0  ;;  %s1055_s0 = inlined_call_operand.hbm [shape: f32[2,8,32], index: 0, kind: input, shape index: {}]   ;;  %s1056_s1 = inlined_call_operand.hbm [shape: f32[2,8,32], index: 1, kind: input, shape index: {}]   ;;  %s1057_s2 = inlined_call_operand.hbm [shape: f32[2,8,32], index: 2, kind: output, shape index: {0}]   ;;  %s1058_s3 = inlined_call_operand.hbm [shape: f32[2,8,8], index: 3, kind: output, shape index: {1}]  }
   0x1   :  { %11 = vsyncpa [#allocation3 + $0x1], 0 }
   0x2   :  { %12 = vsyncpa [#allocation6], 0 }
   0x3   :  { %14 = vsyncpa [#allocation6 + $0x1], 0 }
   0x4   :  { %15 = vsyncpa [#allocation4], 0 }
   0x5   :  { %17 = vsyncpa [#allocation4 + $0x1], 0 }
   0x6   :  { %18 = vsyncpa [#allocation9], 0 }
   0x7   :  { %20 = vsyncpa [#allocation9 + $0x1], 0  ;;  %s849_s12 = smov 0   ;;  %s851_s13 = smov 0  }
   0x8   :  { %s853_s14 = smov 0   ;;  %s855_s15 = smov 0  }
   0x9   :  { %s857_s16 = smov 0   ;;  %s859_s17 = smov 0  }
   0xa LB: > { %s536_s18 = sadd.s32 4294967295, %s821_s17   ;;  %s537_s19 = sadd.s32 4294967294, %s821_s17   ;;  %s821_s17 = sphi %s859_s17, %s26_s17   ;;  %s817_s16 = sphi %s857_s16, %s1070_s16   ;;  %s813_s15 = sphi %s855_s15, %s1069_s15   ;;  %s809_s14 = sphi %s853_s14, %s1068_s14   ;;  %s805_s13 = sphi %s851_s13, %s1067_s13   ;;  %s801_s12 = sphi %s849_s12, %s1066_s12  }
   0xb   : > { %s38_s20 = sadd.s32 1, %s817_s16  ;;  %s47_s21 = sadd.s32 1, %s809_s14 }
   0xc   : > { %p40_p0 = scmp.ge.s32.totalorder %s38_s20, 2  ;;  %p54_p1 = scmp.ne.s32.totalorder %s809_s14, %s805_s13 }
   0xd   : > { %p55_p2 = scmp.eq.s32.totalorder %s821_s17, 0  ;;  %p60_p3 = scmp.ne.s32.totalorder %s805_s13, %s801_s12 }
   0xe   : > { %s1072_s20 = smov (%p40_p0, %s38_s20), 0  ;;  %p61_p5 = scmp.eq.s32.totalorder %s536_s18, 0 }
   0xf   : > { %p890_p4 = por %p55_p2, %p54_p1  ;;  %s42_s23 = ssub.s32 %s817_s16, %s1072_s20 }
  0x10   : > { %p112_p6 = scmp.eq.s32.totalorder %s536_s18, 1  ;;  %p45_p7 = scmp.eq.s32.totalorder %s42_s23, 0 }
  0x11   : > { %p896_p8 = por %p61_p5, %p60_p3  ;;  %p118_p10 = scmp.eq.s32.totalorder %s537_s19, 1 }
  0x12   : > { %p900_p9 = por %p112_p6, %p54_p1  ;;  %p595_p13 = scmp.lt.s32.totalorder %s821_s17, 2 }
  0x13   : > { %s905_s26 = scalar_select %p45_p7, %s809_s14, %s47_s21  }
  0x14   : > { %p907_p11 = por %p118_p10, %p60_p3  ;;  %s914_s28 = sand.u32 1, %s809_s14  }
  0x15   : > { %s540_s29 = sshll.u32 %s914_s28, 3  ;;  %s541_s30 = sshll.u32 %s817_s16, 7 }
  0x16   : > { %s176_s6 = scalar_lea.hbm %s1055_s0, %s541_s30  ;;  %s170_s7 = scalar_lea.vmem [#allocation2], %s540_s29 }
  0x17   : > { %s178_s8 = sshll.u32 %s170_s7, 4  ;;  %p923_p0 = pnand %p595_p13, %p890_p4  ;;  %s179_s8 = int_to_ptr.vmem [resolvable:$true] %s178_s8 }
  0x18   : > { %p544_p1 = scmp.ge.s32.totalorder %s821_s17, 1  ;;  %p201_p2 = scmp.lt.s32.totalorder %s821_s17, 3 }
  0x19   : > { %s167_s10 = scalar_lea.sflag [#allocation3], %s914_s28  ;;  %p653_p3 = pneg %p923_p0 }
  0x1a   : > { %s664_s11 = scalar_lea.vmem %s179_s8, 128  ;;  %s823_s18 = smov [#allocation2]  }
  0x1b   : > { %p665_p5 = scmp.ne.s32.totalorder %s179_s8, %s664_s11  ;;  %s669_s19 = sshll.u32 %s823_s18, 4  ;;  %s670_s19 = int_to_ptr.vmem [resolvable:$false] %s669_s19 }
  0x1c   : > { %s671_s21 = scalar_lea.vmem %s670_s19, 256  ;;  %p672_p4 = scmp.lt.s32.totalorder %s179_s8, %s670_s19 }
  0x1d   : > { %p667_p6 = pnand %p665_p5, %p653_p3  ;;  %p673_p10 = scmp.lt.s32.totalorder %s671_s21, %s664_s11 }
  0x1f   : > { %p668_p7 = pneg %p667_p6  ;;  %p674_p13 = por %p673_p10, %p672_p4 }
  0x21   : > { %p675_p12 = pnand %p674_p13, %p668_p7 }
  0x23   : > { %678 = shalt.err (!%p675_p12)
}
  0x24   : > { %584 = dma.hbm_to_vmem [thread:$0]  (!%p923_p0), %s176_s6, 128, %s179_s8, %s167_s10  }
  0x25   : > { %p941_p5 = pnand %p544_p1, %p201_p2  ;;  %s194_s5 = scalar_lea.hbm %s1056_s1, %s541_s30 }
  0x26   : > { %s189_s7 = scalar_lea.vmem [#allocation5], %s540_s29  ;;  %s186_s18 = scalar_lea.sflag [#allocation6], %s914_s28 }
  0x27   : > { %s196_s11 = sshll.u32 %s189_s7, 4  ;;  %s824_s6 = smov [#allocation5]   ;;  %s197_s11 = int_to_ptr.vmem [resolvable:$true] %s196_s11 }
  0x28   : > { %s692_s19 = scalar_lea.vmem %s197_s11, 128  ;;  %s697_s8 = sshll.u32 %s824_s6, 4  ;;  %s698_s8 = int_to_ptr.vmem [resolvable:$false] %s697_s8 }
  0x29   : > { %p693_p12 = scmp.ne.s32.totalorder %s197_s11, %s692_s19  ;;  %s699_s10 = scalar_lea.vmem %s698_s8, 256 }
  0x2a   : > { %p700_p1 = scmp.lt.s32.totalorder %s197_s11, %s698_s8  ;;  %p701_p2 = scmp.lt.s32.totalorder %s699_s10, %s692_s19 }
  0x2b   : > { %p695_p6 = pnand %p693_p12, %p653_p3 }
  0x2c   : > { %p702_p4 = por %p701_p2, %p700_p1 }
  0x2d   : > { %p696_p7 = pneg %p695_p6 }
  0x2f   : > { %p703_p10 = pnand %p702_p4, %p696_p7 }
  0x31   : > { %706 = shalt.err (!%p703_p10)
}
  0x32   : > { %587 = dma.hbm_to_vmem [thread:$0]  (!%p923_p0), %s194_s5, 128, %s197_s11, %s186_s18  }
  0x33   : > { %205 = sbr.rel (%p941_p5) target bundleno = 786 (0x312), region = 28  ;;  %s957_s28 = sand.u32 (!%p941_p5), 1, %s805_s13  }
  0x34   : > { %s960_s29 = sshll.u32 (!%p941_p5), %s957_s28, 3  ;;  %s208_s30 = scalar_lea.sflag (!%p941_p5), [#allocation3], %s957_s28 }
  0x35   : > { %s211_s21 = scalar_lea.vmem (!%p941_p5), [#allocation2], %s960_s29 }
  0x38   : > { %784 = dma.done.wait (%p896_p8), %s208_s30, 128  }
  0x39   : > { %786 = vsyncadd (%p896_p8), %s208_s30, 4294967168  ;;  %s217_s9 = scalar_lea.sflag [#allocation6], %s957_s28  ;;  %s220_s22 = scalar_lea.vmem [#allocation5], %s960_s29 }
  0x3a   : > { %788 = dma.done.wait (%p896_p8), %s217_s9, 128  }
  0x3b   : > { %790 = vsyncadd (%p896_p8), %s217_s9, 4294967168  ;;  %v825_v0 = vmov 0.0   ;;  %vm826_vm0 = vmmov 0   ;;  %v255_v1 = vld [vmem:[%s220_s22] sm:$0xff]  ;;  %vm258_vm1 = vcmask 261120   ;;  %v254_v4 = vld [vmem:[%s211_s21] sm:$0xff] }
  0x3c   : > { %561 = vmatprep.subr.bf16.mxu0 %v825_v0  ;;  %563 = vmatprep.mubr.msk.bf16.mxu0 %vm826_vm0, %v825_v0  ;;  %v257_v2 = vpack.c.bf16 %v255_v1, %v255_v1  ;;  %v256_v5 = vpack.c.bf16 %v254_v4, %v254_v4  ;;  %vm305_vm2 = vcmask 64512   ;;  %vm321_vm3 = vcmask 1043456   ;;  %s252_s24 = scalar_lea.vmem [#allocation8], %s960_s29  ;;  %s553_s23 = sshll.u32 %s813_s15, 7 }
  0x3d   : > { %567 = vmatprep.subr.bf16.mxu1 %v825_v0  ;;  %569 = vmatprep.mubr.msk.bf16.mxu1 %vm826_vm0, %v825_v0  ;;  %s398_s7 = scalar_lea.hbm %s1058_s3, %s553_s23  ;;  %s400_s11 = sshll.u32 %s252_s24, 4  ;;  %s401_s11 = int_to_ptr.vmem [resolvable:$true] %s400_s11 }
  0x3e   : > { %v263_v3 = vsel %vm258_vm1, %v257_v2, 0  ;;  %v322_v16 = vsel %vm321_vm3, %v257_v2, 0  ;;  %s372_s18 = scalar_lea.sflag [#allocation9], %s957_s28  ;;  %s707_s19 = scalar_lea.vmem %s401_s11, 128 }
  0x3f   : > { %562 = vmatpush3.bf16.xpose.msra.mxu0 %v263_v3  ;;  %568 = vmatpush3.bf16.msra.mxu1 %v322_v16  ;;  %p708_p8 = scmp.ne.s32.totalorder %s401_s11, %s707_s19  ;;  %s827_s6 = smov [#allocation8]  }
  0x40   : > { %s711_s8 = sshll.u32 %s827_s6, 4  ;;  %s712_s8 = int_to_ptr.vmem [resolvable:$false] %s711_s8 }
  0x41   : > { %p709_p0 = pnand %p708_p8, %p900_p9  ;;  %s713_s10 = scalar_lea.vmem %s712_s8, 256 }
  0x42   : > { %p714_p13 = scmp.lt.s32.totalorder %s401_s11, %s712_s8  ;;  %p715_p5 = scmp.lt.s32.totalorder %s713_s10, %s707_s19 }
  0x43   : > { %p710_p3 = pneg %p709_p0 }
  0x44   : > { %p716_p12 = por %p715_p5, %p714_p13 }
  0x46   : > { %564 = vmatmul.mubr.msk.bf16.vlgmr.msra.gmra.mxu0 %vm258_vm1, %v256_v5  ;;  %p717_p6 = pnand %p716_p12, %p710_p3 }
 0x106   : > { %v299_v6 = vpop.f32.mrf.mxu0 }
 0x107   : > { %v306_v7 = vsel %vm305_vm2, %v299_v6, -inf }
 0x108   : > { %307 = vmax.xlane.f32.xlu0 %v306_v7  ;;  %v565_v8 = vpop.f32.mrf.mxu0 }
 0x10a   : > { %v302_v9 = vpop.f32.mrf.mxu0 }
 0x10c   : > { %v566_v10 = vpop.f32.mrf.mxu0 }
 0x191   : > { %v308_v11 = vpop.xlane.xlu0 %307 }
 0x192   : > { %v309_v12 = vsub.f32 %v299_v6, %v308_v11 }
 0x194   : > { %v310_v13 = vmul.f32 1.442695, %v309_v12 }
 0x196   : > { %647 = vpow2.f32 %v310_v13 }
 0x1a3   : > { %v648_v14 = vpop.eup %647 }
 0x1a4   : > { %v312_v15 = vsel %vm305_vm2, %v648_v14, 0.0 }
 0x1a5   : > { %313 = vadd.xlane.f32.xlu0 %v312_v15 }
 0x22e   : > { %v314_v17 = vpop.xlane.xlu0 %313 }
 0x22f   : > { %649 = vrcp.f32 %v314_v17 }
 0x23c   : > { %v650_v18 = vpop.eup %649 }
 0x23d   : > { %v316_v19 = vmul.f32 %v650_v18, %v648_v14 }
 0x23f   : > { %v317_v20 = vpack.c.bf16 %v316_v19, %v316_v19  ;;  %364 = vst.msk [vmem:[%s252_s24] sm:$0xff] %vm305_vm2, %v316_v19 }
 0x241   : > { %570 = vmatmul.mubr.msk.bf16.vlgmr.msra.gmra.mxu1 %vm305_vm2, %v317_v20 }
 0x242   : > { %720 = shalt.err (!%p717_p6)
}
 0x243   : > { %s721_s30 = scalar_lea.hbm %s398_s7, 128  ;;  %s725_s22 = scalar_lea.hbm %s1058_s3, 256 }
 0x244   : > { %p722_p7 = scmp.ne.s32.totalorder %s398_s7, %s721_s30  ;;  %p726_p4 = scmp.lt.s32.totalorder %s398_s7, %s1058_s3 }
 0x245   : > { %p727_p10 = scmp.lt.s32.totalorder %s725_s22, %s721_s30 }
 0x246   : > { %p723_p1 = pnand %p722_p7, %p900_p9 }
 0x247   : > { %p728_p8 = por %p727_p10, %p726_p4 }
 0x248   : > { %p724_p2 = pneg %p723_p1 }
 0x24a   : > { %p729_p0 = pnand %p728_p8, %p724_p2 }
 0x24c   : > { %732 = shalt.err (!%p729_p0)
}
 0x24d   : > { %578 = dma.vmem_to_hbm [thread:$0]  (%p900_p9), %s401_s11, 128, %s398_s7, %s372_s18  }
 0x24e   : > { %s245_s5 = scalar_lea.vmem [#allocation7], %s960_s29  ;;  %s1006_s10 = scalar_lea.hbm %s1057_s2, %s553_s23 }
 0x24f   : > { %s386_s19 = sshll.u32 %s245_s5, 4  ;;  %s367_s30 = scalar_lea.sflag [#allocation4], %s957_s28  ;;  %s1008_s19 = int_to_ptr.vmem [resolvable:$true] %s386_s19 }
 0x250   : > { %s733_s21 = scalar_lea.vmem %s1008_s19, 128  ;;  %s828_s15 = smov [#allocation7]  }
 0x251   : > { %p734_p3 = scmp.ne.s32.totalorder %s1008_s19, %s733_s21  ;;  %s737_s29 = sshll.u32 %s828_s15, 4  ;;  %s738_s29 = int_to_ptr.vmem [resolvable:$false] %s737_s29 }
 0x252   : > { %s739_s23 = scalar_lea.vmem %s738_s29, 256  ;;  %p740_p12 = scmp.lt.s32.totalorder %s1008_s19, %s738_s29 }
 0x253   : > { %p735_p13 = pnand %p734_p3, %p900_p9  ;;  %p741_p6 = scmp.lt.s32.totalorder %s739_s23, %s733_s21 }
 0x255   : > { %p736_p5 = pneg %p735_p13  ;;  %p742_p7 = por %p741_p6, %p740_p12 }
 0x257   : > { %p743_p1 = pnand %p742_p7, %p736_p5 }
 0x301   : > { %v358_v21 = vpop.f32.mrf.mxu1 }
 0x302   : > { %365 = vst.msk [vmem:[%s245_s5] sm:$0xff] %vm258_vm1, %v358_v21 }
 0x303   : > { %v571_v22 = vpop.f32.mrf.mxu1 }
 0x304   : > { %746 = shalt.err (!%p743_p1)
}
 0x305   : > { %s747_s7 = scalar_lea.hbm %s1006_s10, 128  ;;  %s751_s18 = scalar_lea.hbm %s1057_s2, 256 }
 0x306   : > { %p748_p2 = scmp.ne.s32.totalorder %s1006_s10, %s747_s7  ;;  %p752_p8 = scmp.lt.s32.totalorder %s1006_s10, %s1057_s2 }
 0x307   : > { %p753_p0 = scmp.lt.s32.totalorder %s751_s18, %s747_s7 }
 0x308   : > { %p749_p4 = pnand %p748_p2, %p900_p9 }
 0x309   : > { %p754_p3 = por %p753_p0, %p752_p8 }
 0x30a   : > { %p750_p10 = pneg %p749_p4 }
 0x30c   : > { %p755_p13 = pnand %p754_p3, %p750_p10 }
 0x30e   : > { %758 = shalt.err (!%p755_p13)
}
 0x30f   : > { %577 = dma.vmem_to_hbm [thread:$0]  (%p900_p9), %s1008_s19, 128, %s1006_s10, %s367_s30   ;;  %v361_v23 = vpop.f32.mrf.mxu1 }
 0x311   : > { %v572_v24 = vpop.f32.mrf.mxu1 }
 0x312 PF: > { %s412_s24 = sand.u32 1, %s801_s12   ;;  %p1065_p5 = scmp.ge.s32.totalorder %s821_s17, 2 }
 0x313   : > { %s413_s4 = scalar_lea.sflag [#allocation4], %s412_s24 }
 0x314   : > { %p589_p12 = pnand %p1065_p5, %p907_p11 }
 0x316   : > { %p590_p6 = pneg %p589_p12 }
 0x318   : > { %792 = dma.done.wait (%p590_p6), %s413_s4, 128  }
 0x319   : > { %794 = vsyncadd (%p590_p6), %s413_s4, 4294967168  ;;  %s422_s5 = scalar_lea.sflag [#allocation9], %s412_s24 }
 0x31a   : > { %796 = dma.done.wait (%p590_p6), %s422_s5, 128  }
 0x31b   : > { %798 = vsyncadd (%p590_p6), %s422_s5, 4294967168  ;;  %s26_s17 = sadd.s32 1, %s821_s17   ;;  %s1066_s12 = smov %s805_s13 }
 0x31c   : > { %p23_p9 = scmp.ge.s32.totalorder %s26_s17, 4   ;;  %s1067_s13 = smov %s809_s14 }
 0x31d   : > { %s1068_s14 = smov %s905_s26  ;;  %s1069_s15 = smov %s817_s16 }
 0x31e   : > { %s1070_s16 = smov %s1072_s20  ;;  %25 = sbr.rel (!%p23_p9) target bundleno = 10 (0xa), region = 103 }
 0x323   :  { %427 = vsyncpa [#allocation3], 1 }
 0x324   :  { %429 = vsyncpa [#allocation3 + $0x1], 1 }
 0x325   :  { %430 = vsyncpa [#allocation6], 1 }
 0x326   :  { %432 = vsyncpa [#allocation6 + $0x1], 1 }
 0x327   :  { %433 = vsyncpa [#allocation4], 1 }
 0x328   :  { %435 = vsyncpa [#allocation4 + $0x1], 1 }
 0x329   :  { %436 = vsyncpa [#allocation9], 1 }
 0x32a   :  { %438 = vsyncpa [#allocation9 + $0x1], 1 }

</bundles_post_ra>
